<compile_context>
chip_gen: v6e
topology: v6e:2x2x1
jax: 0.10.0
libtpu: 0.0.40
codegen_flags: <defaults>
</compile_context>

<pallas_src>
import math

import jax
import jax.numpy as jnp
from jax.experimental import pallas as pl
from jax.experimental.pallas import tpu as pltpu


_FAST_PATH_BYTES = 32 * 1024          # below this, skip pallas entirely
_TARGET_TILE_BYTES = 4 * 1024 * 1024  # ~4 MiB per x tile (f32)
_RESIDENT_WARP_BYTES = 2 * 1024 * 1024


def _round_up(n: int, m: int) -> int:
    return ((n + m - 1) // m) * m


def _magnitude_warp_kernel(warp_ref, x_ref, o_ref):
    # x_ref/o_ref: (TR, TL) tiles of the flattened input/output.
    # warp_ref: either the full (1, Lp) resident warp row (sliced per lane tile)
    # or a (1, TL) streamed tile. Compute in f32, cast once on store.
    tl = o_ref.shape[-1]
    if warp_ref.shape[-1] == tl:
        w = warp_ref[...]
    else:
        start = pl.multiple_of(pl.program_id(1) * tl, 128)
        w = warp_ref[:, pl.ds(start, tl)]
    o_ref[...] = (x_ref[...].astype(jnp.float32) * w).astype(o_ref.dtype)


def _apply_warp_pallas(x, warp_f32):
    """out = x * warp (broadcast over last axis), single streaming pass."""
    orig_shape = x.shape
    dtype = x.dtype
    L = orig_shape[-1]
    x2 = x.reshape(-1, L)
    R = x2.shape[0]

    itemsize = jnp.dtype(dtype).itemsize
    sub = {4: 8, 2: 16, 1: 32}.get(itemsize, 8)   # sublane packing unit per dtype

    # Lane tile: full (rounded) length up to 2048 lanes.
    TL = min(_round_up(L, 128), 2048)
    # Row tile: target ~4 MiB per tile, multiple of the packing unit, capped at 1024.
    row_cap = max(sub, (_TARGET_TILE_BYTES // (TL * itemsize)) // sub * sub)
    row_cap = min(row_cap, 1024)
    TR = min(_round_up(R, sub), row_cap)

    grid_r = pl.cdiv(R, TR)
    grid_l = pl.cdiv(L, TL)
    Lp = grid_l * TL

    # Pad only the tiny warp vector (with 1.0) so in-kernel lane slices never go OOB.
    warp2 = jnp.pad(warp_f32, (0, Lp - L), constant_values=1.0).reshape(1, Lp)

    # Keep the warp row VMEM-resident (one DMA total) unless L is enormous.
    if Lp * 4 <= _RESIDENT_WARP_BYTES:
        warp_spec = pl.BlockSpec((1, Lp), lambda i, j: (0, 0))
    else:
        warp_spec = pl.BlockSpec((1, TL), lambda i, j: (0, j))

    out2 = pl.pallas_call(
        _magnitude_warp_kernel,
        out_shape=jax.ShapeDtypeStruct((R, L), dtype),
        grid=(grid_r, grid_l),
        in_specs=[
            warp_spec,                                     # tiny warp factor
            pl.BlockSpec((TR, TL), lambda i, j: (i, j)),   # x tile (edge blocks masked)
        ],
        out_specs=pl.BlockSpec((TR, TL), lambda i, j: (i, j)),
        compiler_params=pltpu.CompilerParams(
            dimension_semantics=("parallel", "parallel"),
            vmem_limit_bytes=48 * 1024 * 1024,
        ),
    )(warp2, x2)
    return out2.reshape(orig_shape)


def magnitude_warping(x, key, probability: float = 1.0, sigma: float = 0.1):
    """JAX/Pallas equivalent of MagnitudeWarping.forward.

    x   : (..., channels, length) array.
    key : PRNG key driving both the probability gate and the random phase.
    """
    L = x.shape[-1]
    dtype = x.dtype

    # ---- tiny (L,) warp factor, computed once in plain JAX -------------------------
    k_gate, k_phase = jax.random.split(key)
    gate = jax.random.uniform(k_gate, (), dtype=jnp.float32)        # torch.rand(1)
    phase = jax.random.uniform(k_phase, (L,), dtype=jnp.float32)    # torch.rand(L)
    base = jnp.linspace(0.0, 4.0 * math.pi, L, dtype=jnp.float32)   # safe for L == 1
    warp = 1.0 + jnp.float32(sigma) * jnp.sin(base + 2.0 * math.pi * phase)  # (L,) f32

    # Static shortcut: probability <= 0 never applies the augmentation.
    if probability <= 0.0:
        return x

    # Tiny-input fast path: XLA fuses the broadcast multiply; no pallas launch,
    # no padding, no fixed launch overhead.
    if x.size * jnp.dtype(dtype).itemsize <= _FAST_PATH_BYTES:
        factor = jnp.where(jnp.float32(probability) > gate, warp, jnp.float32(1.0))
        return (x.astype(jnp.float32) * factor).astype(dtype)

    if probability >= 1.0:
        # Gate always true (gate ~ U[0,1)); skip the cond entirely.
        return _apply_warp_pallas(x, warp)

    # Hoisted probability gate: skipping the augmentation skips the full HBM pass.
    return jax.lax.cond(
        jnp.float32(probability) > gate,
        lambda xv, wv: _apply_warp_pallas(xv, wv),
        lambda xv, wv: xv,
        x, warp,
    )


if __name__ == "__main__":
    root = jax.random.PRNGKey(0)
    k_in1, k_in2, k_in3, k_aug = jax.random.split(root, 4)

    def reference(x, key, probability, sigma):
        L = x.shape[-1]
        kg, kp = jax.random.split(key)
        gate = jax.random.uniform(kg, (), dtype=jnp.float32)
        phase = jax.random.uniform(kp, (L,), dtype=jnp.float32)
        base = jnp.linspace(0.0, 4.0 * math.pi, L, dtype=jnp.float32)
        w = jnp.where(jnp.float32(probability) > gate,
                      1.0 + jnp.float32(sigma) * jnp.sin(base + 2.0 * math.pi * phase),
                      jnp.float32(1.0))
        return (x.astype(jnp.float32) * w).astype(x.dtype)

    # 1) Main Pallas path: (batch=2, channels=4, length=2048) f32 (tile-friendly).
    x1 = jax.random.normal(k_in1, (2, 4, 2048), dtype=jnp.float32)
    out1 = jax.block_until_ready(magnitude_warping(x1, k_aug, probability=1.0, sigma=0.1))
    assert out1.shape == x1.shape and out1.dtype == x1.dtype
    assert bool(jnp.all(jnp.isfinite(out1)))
    assert bool(jnp.allclose(out1, reference(x1, k_aug, 1.0, 0.1), atol=1e-5, rtol=1e-5))

    # 2) Non-divisible shape: exercises cdiv grid + masked edge blocks (no padding of x).
    x2 = jax.random.normal(k_in2, (3, 5, 700), dtype=jnp.float32)
    out2 = jax.block_until_ready(magnitude_warping(x2, k_aug, probability=1.0, sigma=0.1))
    assert out2.shape == x2.shape
    assert bool(jnp.all(jnp.isfinite(out2)))
    assert bool(jnp.allclose(out2, reference(x2, k_aug, 1.0, 0.1), atol=1e-5, rtol=1e-5))

    # 3) Stochastic gate path: lax.cond around the pallas_call.
    out3 = jax.block_until_ready(magnitude_warping(x1, k_aug, probability=0.3, sigma=0.1))
    assert bool(jnp.allclose(out3, reference(x1, k_aug, 0.3, 0.1), atol=1e-5, rtol=1e-5))

    # 4) Tiny input: plain-JAX fast path (no pallas launch).
    x4 = jax.random.normal(k_in3, (2, 4, 16), dtype=jnp.float32)
    out4 = jax.block_until_ready(magnitude_warping(x4, k_aug, probability=1.0, sigma=0.1))
    assert bool(jnp.allclose(out4, reference(x4, k_aug, 1.0, 0.1), atol=1e-5, rtol=1e-5))

    print("KERNEL_OK")
</pallas_src>

<mosaic_0001>
module attributes {stable_mosaic.version = 11 : i64} {
  func.func @_magnitude_warp_kernel(%arg0: i32, %arg1: i32, %arg2: memref<1x2048xf32, #tpu.memory_space<vmem>>, %arg3: memref<8x2048xf32, #tpu.memory_space<vmem>>, %arg4: memref<8x2048xf32, #tpu.memory_space<vmem>>) attributes {dimension_semantics = [#tpu.dimension_semantics<parallel>, #tpu.dimension_semantics<parallel>], iteration_bounds = array<i64: 1, 1>, scalar_prefetch = 0 : i64, scratch_operands = 0 : i64, tpu.core_type = #tpu.core_type<tc>, window_params = [{pipeline_mode = #tpu.pipeline_mode<synchronous>, transform_indices = @transform_0, window_bounds = array<i64: 1, 2048>}, {transform_indices = @transform_1, window_bounds = array<i64: 8, 2048>}, {transform_indices = @transform_2, window_bounds = array<i64: 8, 2048>}]} {
    %c0 = arith.constant 0 : index
    %c0_0 = arith.constant 0 : index
    %0 = vector.load %arg2[%c0, %c0_0] : memref<1x2048xf32, #tpu.memory_space<vmem>>, vector<1x2048xf32>
    %c0_1 = arith.constant 0 : index
    %c0_2 = arith.constant 0 : index
    %1 = vector.load %arg3[%c0_1, %c0_2] : memref<8x2048xf32, #tpu.memory_space<vmem>>, vector<8x2048xf32>
    %2 = vector.broadcast %0 : vector<1x2048xf32> to vector<8x2048xf32>
    %3 = arith.mulf %1, %2 : vector<8x2048xf32>
    %c0_3 = arith.constant 0 : index
    %c0_4 = arith.constant 0 : index
    %4 = vector.load %arg4[%c0_3, %c0_4] : memref<8x2048xf32, #tpu.memory_space<vmem>>, vector<8x2048xf32>
    tpu.vector_store %arg4[%c0_3, %c0_4], %3 {strides = array<i32>} : memref<8x2048xf32, #tpu.memory_space<vmem>>, vector<8x2048xf32>,
    return
  }
  func.func @transform_0(%arg0: i32, %arg1: i32) -> (i32, i32) {
    %c0_i32 = arith.constant 0 : i32
    %c0_i32_0 = arith.constant 0 : i32
    %c0_i32_1 = arith.constant 0 : i32
    return %c0_i32, %c0_i32_0 : i32, i32
  }
  func.func @transform_1(%arg0: i32, %arg1: i32) -> (i32, i32) {
    %c0_i32 = arith.constant 0 : i32
    return %arg0, %arg1 : i32, i32
  }
  func.func @transform_2(%arg0: i32, %arg1: i32) -> (i32, i32) {
    %c0_i32 = arith.constant 0 : i32
    return %arg0, %arg1 : i32, i32
  }
}

</mosaic_0001>

<bundles_post_ra>
// kernel: tpu_custom_call.1
= control target key start
LH: loop header
LB: loop body
LE: loop exit
PB: predicated region body
PF: predicated region fallthrough
CT: control target
= control target key end

     0   :  { %7 = vsyncpa [#allocation3], 0  ;;  %s280_s0 = inlined_call_operand.hbm [shape: f32[1,2048], index: 0, kind: input, shape index: {}]   ;;  %s281_s1 = inlined_call_operand.hbm [shape: f32[8,2048], index: 1, kind: input, shape index: {}]   ;;  %s282_s2 = inlined_call_operand.hbm [shape: f32[8,2048], index: 2, kind: output, shape index: {}]  }
   0x1   :  { %8 = vsyncpa [#allocation6], 0 }
   0x2   :  { %9 = vsyncpa [#allocation4], 0  ;;  %s253_s9 = smov [#allocation2]   ;;  %s254_s11 = smov [#allocation5]  }
   0x3   :  { %s16_s10 = sshll.u32 %s253_s9, 4  ;;  %s26_s12 = sshll.u32 %s254_s11, 4  ;;  %s17_s10 = int_to_ptr.vmem [resolvable:$true] %s16_s10  ;;  %s27_s12 = int_to_ptr.vmem [resolvable:$true] %s26_s12 }
   0x4   :  { %s195_s13 = scalar_lea.vmem %s17_s10, 256  ;;  %p200_p1 = scmp.lt.s32.totalorder %s17_s10, %s17_s10 }
   0x5   :  { %p196_p0 = scmp.ne.s32.totalorder %s17_s10, %s195_s13  ;;  %p201_p2 = scmp.lt.s32.totalorder %s195_s13, %s195_s13 }
   0x7   :  { %p202_p3 = por %p201_p2, %p200_p1 }
   0x9   :  { %p203_p4 = pnand %p202_p3, %p196_p0 }
   0xb   :  { %206 = shalt.err (!%p203_p4)
}
   0xc   :  { %19 = dma.hbm_to_vmem [thread:$0]  %s280_s0, 256, %s17_s10, [#allocation3]  }
   0xd   :  { %s215_s16 = scalar_lea.vmem %s27_s12, 2048  ;;  %p220_p6 = scmp.lt.s32.totalorder %s27_s12, %s27_s12 }
   0xe   :  { %p216_p5 = scmp.ne.s32.totalorder %s27_s12, %s215_s16  ;;  %p221_p7 = scmp.lt.s32.totalorder %s215_s16, %s215_s16 }
  0x10   :  { %p222_p8 = por %p221_p7, %p220_p6 }
  0x12   :  { %p223_p9 = pnand %p222_p8, %p216_p5 }
  0x14   :  { %226 = shalt.err (!%p223_p9)
}
  0x15   :  { %29 = dma.hbm_to_vmem [thread:$0]  %s281_s1, 2048, %s27_s12, [#allocation6]  }
  0x16   :  { %247 = dma.done.wait [#allocation3], 256  }
  0x17   :  { %248 = vsyncadd [#allocation3], 4294967040 }
  0x18   :  { %249 = dma.done.wait [#allocation6], 2048  }
  0x19   :  { %250 = vsyncadd [#allocation6], 4294965248  ;;  %v56_v0 = vlaneseq  ;;  %v36_v10 = vld [vmem:[#allocation2] sm:$0xff]  ;;  %v38_v11 = vld [vmem:[#allocation5] sm:$0xff]  ;;  %s255_s0 = smov [#allocation7]  }
  0x1a   :  { %v39_v12 = vld [vmem:[#allocation5 + $0x8] sm:$0xff]  ;;  %v40_v15 = vld [vmem:[#allocation5 + $0x10] sm:$0xff]  ;;  %v41_v17 = vld [vmem:[#allocation5 + $0x18] sm:$0xff]  ;;  %s174_s1 = sshll.u32 %s255_s0, 4  ;;  %s175_s1 = int_to_ptr.vmem [resolvable:$true] %s174_s1 }
  0x1b   :  { %v57_v1 = vshrl.u32 %v56_v0, 7  ;;  %v42_v19 = vld [vmem:[#allocation5 + $0x20] sm:$0xff]  ;;  %v43_v21 = vld [vmem:[#allocation5 + $0x28] sm:$0xff]  ;;  %v44_v23 = vld [vmem:[#allocation5 + $0x30] sm:$0xff]  ;;  %s227_s19 = scalar_lea.vmem %s175_s1, 2048  ;;  %p232_p11 = scmp.lt.s32.totalorder %s175_s1, %s175_s1 }
  0x1c   :  { %v45_v25 = vld [vmem:[#allocation5 + $0x38] sm:$0xff]  ;;  %v46_v32 = vld [vmem:[#allocation5 + $0x40] sm:$0xff]  ;;  %v47_v33 = vld [vmem:[#allocation5 + $0x48] sm:$0xff]  ;;  %p228_p10 = scmp.ne.s32.totalorder %s175_s1, %s227_s19  ;;  %p233_p12 = scmp.lt.s32.totalorder %s227_s19, %s227_s19 }
  0x1d   :  { %v58_v2 = vsub.s32 0, %v57_v1  ;;  %v62_v3 = vsub.s32 1, %v57_v1  ;;  %v66_v4 = vsub.s32 2, %v57_v1  ;;  %v70_v5 = vsub.s32 3, %v57_v1  ;;  %v37_v31 = vld [vmem:[#allocation2 + $0x8] sm:$0xff]  ;;  %v48_v38 = vld [vmem:[#allocation5 + $0x50] sm:$0xff] }
  0x1e   :  { %v74_v6 = vsub.s32 4, %v57_v1  ;;  %v78_v7 = vsub.s32 5, %v57_v1  ;;  %v82_v8 = vsub.s32 6, %v57_v1  ;;  %v86_v9 = vsub.s32 7, %v57_v1  ;;  %v49_v39 = vld [vmem:[#allocation5 + $0x58] sm:$0xff]  ;;  %v50_v40 = vld [vmem:[#allocation5 + $0x60] sm:$0xff]  ;;  %p234_p13 = por %p233_p12, %p232_p11 }
  0x1f   :  { %v59_v13 = vrot.slane %v36_v10, %v58_v2  ;;  %v63_v14 = vrot.slane %v36_v10, %v62_v3  ;;  %v67_v16 = vrot.slane %v36_v10, %v66_v4  ;;  %v71_v18 = vrot.slane %v36_v10, %v70_v5  ;;  %v51_v45 = vld [vmem:[#allocation5 + $0x68] sm:$0xff]  ;;  %v52_v46 = vld [vmem:[#allocation5 + $0x70] sm:$0xff]  ;;  %v53_v47 = vld [vmem:[#allocation5 + $0x78] sm:$0xff] }
  0x20   :  { %v75_v20 = vrot.slane %v36_v10, %v74_v6  ;;  %v79_v22 = vrot.slane %v36_v10, %v78_v7  ;;  %v83_v24 = vrot.slane %v36_v10, %v82_v8  ;;  %v87_v26 = vrot.slane %v36_v10, %v86_v9  ;;  %p235_p0 = pnand %p234_p13, %p228_p10 }
  0x21   :  { %v136_v27 = vmul.f32 %v59_v13, %v38_v11  ;;  %v137_v28 = vmul.f32 %v63_v14, %v39_v12  ;;  %v138_v29 = vmul.f32 %v67_v16, %v40_v15  ;;  %v139_v30 = vmul.f32 %v71_v18, %v41_v17 }
  0x22   :  { %v140_v34 = vmul.f32 %v75_v20, %v42_v19  ;;  %v141_v35 = vmul.f32 %v79_v22, %v43_v21  ;;  %v142_v36 = vmul.f32 %v83_v24, %v44_v23  ;;  %v143_v37 = vmul.f32 %v87_v26, %v45_v25 }
  0x23   :  { %152 = vst [vmem:[#allocation7] sm:$0xff] %v136_v27  ;;  %153 = vst [vmem:[#allocation7 + $0x8] sm:$0xff] %v137_v28  ;;  %v91_v41 = vrot.slane %v37_v31, %v58_v2  ;;  %v95_v42 = vrot.slane %v37_v31, %v62_v3  ;;  %v99_v43 = vrot.slane %v37_v31, %v66_v4 }
  0x24   :  { %154 = vst [vmem:[#allocation7 + $0x10] sm:$0xff] %v138_v29  ;;  %155 = vst [vmem:[#allocation7 + $0x18] sm:$0xff] %v139_v30  ;;  %v103_v44 = vrot.slane %v37_v31, %v70_v5  ;;  %v107_v48 = vrot.slane %v37_v31, %v74_v6  ;;  %v111_v49 = vrot.slane %v37_v31, %v78_v7 }
  0x25   :  { %156 = vst [vmem:[#allocation7 + $0x20] sm:$0xff] %v140_v34  ;;  %157 = vst [vmem:[#allocation7 + $0x28] sm:$0xff] %v141_v35  ;;  %v115_v50 = vrot.slane %v37_v31, %v82_v8  ;;  %v119_v51 = vrot.slane %v37_v31, %v86_v9  ;;  %v144_v52 = vmul.f32 %v91_v41, %v46_v32 }
  0x26   :  { %158 = vst [vmem:[#allocation7 + $0x30] sm:$0xff] %v142_v36  ;;  %159 = vst [vmem:[#allocation7 + $0x38] sm:$0xff] %v143_v37  ;;  %v145_v53 = vmul.f32 %v95_v42, %v47_v33  ;;  %v146_v54 = vmul.f32 %v99_v43, %v48_v38  ;;  %v147_v55 = vmul.f32 %v103_v44, %v49_v39 }
  0x27   :  { %v148_v56 = vmul.f32 %v107_v48, %v50_v40  ;;  %v149_v57 = vmul.f32 %v111_v49, %v51_v45  ;;  %v150_v58 = vmul.f32 %v115_v50, %v52_v46  ;;  %v151_v59 = vmul.f32 %v119_v51, %v53_v47  ;;  %160 = vst [vmem:[#allocation7 + $0x40] sm:$0xff] %v144_v52 }
  0x28   :  { %161 = vst [vmem:[#allocation7 + $0x48] sm:$0xff] %v145_v53  ;;  %162 = vst [vmem:[#allocation7 + $0x50] sm:$0xff] %v146_v54 }
  0x29   :  { %163 = vst [vmem:[#allocation7 + $0x58] sm:$0xff] %v147_v55  ;;  %164 = vst [vmem:[#allocation7 + $0x60] sm:$0xff] %v148_v56 }
  0x2a   :  { %165 = vst [vmem:[#allocation7 + $0x68] sm:$0xff] %v149_v57  ;;  %166 = vst [vmem:[#allocation7 + $0x70] sm:$0xff] %v150_v58 }
  0x2b   :  { %167 = vst [vmem:[#allocation7 + $0x78] sm:$0xff] %v151_v59 }
  0x2c   :  { %238 = shalt.err (!%p235_p0)
}
  0x2d   :  { %177 = dma.vmem_to_hbm [thread:$0]  %s175_s1, 2048, %s282_s2, [#allocation4]  }
  0x2e   :  { %251 = dma.done.wait [#allocation4], 2048  }
  0x2f   :  { %252 = vsyncadd [#allocation4], 4294965248 }
  0x30   :  { %181 = vsyncpa [#allocation3], 1 }
  0x31   :  { %182 = vsyncpa [#allocation6], 1 }
  0x32   :  { %183 = vsyncpa [#allocation4], 1 }

</bundles_post_ra>
